<compile_context>
chip_gen: v6e
topology: v6e:2x2x1
jax: 0.10.0
libtpu: 0.0.40
codegen_flags: <defaults>
</compile_context>

<pallas_src>
import math
from functools import partial

import jax
import jax.numpy as jnp
from jax import lax
from jax.experimental import pallas as pl
from jax.experimental.pallas import tpu as pltpu

LN_EPS = 1e-5  # nn.LayerNorm default


def _patch_embed_kernel(patches_ref, w_ref, b_ref, gamma_ref, beta_ref, o_ref):
    """(TM, K) @ (K, Cout) on the MXU (f32 accumulation), then fused LayerNorm."""
    x = jnp.dot(patches_ref[...], w_ref[...], preferred_element_type=jnp.float32)
    x = x + b_ref[...]                                   # (1, Cout) broadcast over rows

    mean = jnp.mean(x, axis=-1, keepdims=True)
    centered = x - mean
    var = jnp.mean(centered * centered, axis=-1, keepdims=True)
    x_norm = centered * lax.rsqrt(var + LN_EPS)          # rsqrt -> EUP slot
    o_ref[...] = (x_norm * gamma_ref[...] + beta_ref[...]).astype(o_ref.dtype)


def overlap_patch_embed(x_nchw, weight, bias, ln_gamma, ln_beta, *, stride,
                        block_rows=2048, matmul_dtype=jnp.bfloat16):
    """x_nchw: (B, Cin, H, W); weight: (Cout, Cin, KH, KW) (PyTorch conv layout).

    Returns (B, H_out, W_out, Cout) float32, matching the PyTorch module output layout.
    """
    B, Cin, H, W = x_nchw.shape
    Cout, _, KH, KW = weight.shape
    pad_h, pad_w = KH // 2, KW // 2
    H_out = (H + 2 * pad_h - KH) // stride + 1
    W_out = (W + 2 * pad_w - KW) // stride + 1
    K = KH * KW * Cin
    N = B * H_out * W_out

    # ---------------- glue: layout + patch extraction (pure data movement) --------------
    # Cast to the matmul dtype up front so the materialized patches matrix (and its
    # in-kernel read) moves half the bytes.
    x_nhwc = jnp.transpose(x_nchw, (0, 2, 3, 1)).astype(matmul_dtype)
    x_pad = jnp.pad(x_nhwc, ((0, 0), (pad_h, pad_h), (pad_w, pad_w), (0, 0)))

    # Vectorized im2col: KH*KW strided slices (column order = (kh, kw, cin)).
    h_lim = (H_out - 1) * stride + 1
    w_lim = (W_out - 1) * stride + 1
    slices = [
        x_pad[:, kh:kh + h_lim:stride, kw:kw + w_lim:stride, :]   # (B, H_out, W_out, Cin)
        for kh in range(KH) for kw in range(KW)
    ]
    patches = jnp.stack(slices, axis=3)                  # (B, H_out, W_out, KH*KW, Cin)
    patches = patches.reshape(N, K)

    # Conv weight flattened to match the (kh, kw, cin) patch-column order.
    w2d = jnp.transpose(weight, (2, 3, 1, 0)).reshape(K, Cout).astype(matmul_dtype)
    b2d = bias.astype(jnp.float32).reshape(1, Cout)
    gamma2d = ln_gamma.astype(jnp.float32).reshape(1, Cout)
    beta2d = ln_beta.astype(jnp.float32).reshape(1, Cout)

    # ---------------- Pallas call: row-tiled GEMM + fused LayerNorm ---------------------
    TM = N if N <= block_rows else block_rows            # sweep block_rows per generation
    grid = (pl.cdiv(N, TM),)

    itemsize = jnp.dtype(matmul_dtype).itemsize
    out2d = pl.pallas_call(
        _patch_embed_kernel,
        out_shape=jax.ShapeDtypeStruct((N, Cout), jnp.float32),
        grid=grid,
        in_specs=[
            pl.BlockSpec((TM, K), lambda i: (i, 0)),      # patch tile (double-buffered)
            pl.BlockSpec((K, Cout), lambda i: (0, 0)),    # weight  (VMEM-resident)
            pl.BlockSpec((1, Cout), lambda i: (0, 0)),    # bias
            pl.BlockSpec((1, Cout), lambda i: (0, 0)),    # gamma
            pl.BlockSpec((1, Cout), lambda i: (0, 0)),    # beta
        ],
        out_specs=pl.BlockSpec((TM, Cout), lambda i: (i, 0)),
        compiler_params=pltpu.CompilerParams(
            dimension_semantics=("parallel",),            # megacore split on v7x
        ),
        cost_estimate=pl.CostEstimate(
            flops=2 * N * K * Cout,
            transcendentals=N,
            bytes_accessed=N * K * itemsize + K * Cout * itemsize + N * Cout * 4,
        ),
    )(patches, w2d, b2d, gamma2d, beta2d)

    # Contiguous reshape (free) to NHWC -- matches the PyTorch output after permute.
    return out2d.reshape(B, H_out, W_out, Cout)


def _reference(x_nchw, weight, bias, ln_gamma, ln_beta, *, stride):
    """Plain-JAX reference: lax conv + LayerNorm (f32)."""
    KH, KW = weight.shape[2], weight.shape[3]
    y = lax.conv_general_dilated(
        x_nchw, weight,
        window_strides=(stride, stride),
        padding=((KH // 2, KH // 2), (KW // 2, KW // 2)),
        dimension_numbers=("NCHW", "OIHW", "NCHW"),
    ) + bias.reshape(1, -1, 1, 1)
    y = jnp.transpose(y, (0, 2, 3, 1))  # NHWC
    mean = jnp.mean(y, axis=-1, keepdims=True)
    var = jnp.mean((y - mean) ** 2, axis=-1, keepdims=True)
    return (y - mean) * lax.rsqrt(var + LN_EPS) * ln_gamma + ln_beta


if __name__ == "__main__":
    # Small shapes consistent with the module's forward.
    B, Cin, H, W = 2, 4, 16, 16
    patch_size, stride, embed_dim = 7, 4, 32

    key = jax.random.PRNGKey(0)
    k_x, k_w = jax.random.split(key)

    x = jax.random.normal(k_x, (B, Cin, H, W), dtype=jnp.float32)

    # Deterministic init mirroring _init_weights:
    #   Conv2d: weight ~ N(0, sqrt(2/fan_out)), bias = 0; LayerNorm: gamma=1, beta=0.
    fan_out = patch_size * patch_size * embed_dim
    w = jax.random.normal(k_w, (embed_dim, Cin, patch_size, patch_size),
                          dtype=jnp.float32) * math.sqrt(2.0 / fan_out)
    b = jnp.zeros((embed_dim,), dtype=jnp.float32)
    gamma = jnp.ones((embed_dim,), dtype=jnp.float32)
    beta = jnp.zeros((embed_dim,), dtype=jnp.float32)

    ref = _reference(x, w, b, gamma, beta, stride=stride)

    # 1) f32-operand path: tight check of the kernel math / layout handling.
    fn_f32 = jax.jit(partial(overlap_patch_embed, stride=stride,
                             matmul_dtype=jnp.float32))
    out_f32 = jax.block_until_ready(fn_f32(x, w, b, gamma, beta))
    assert out_f32.shape == (B, H // stride, W // stride, embed_dim), out_f32.shape
    assert jnp.allclose(out_f32, ref, atol=1e-4, rtol=1e-4), \
        float(jnp.max(jnp.abs(out_f32 - ref)))

    # 2) Default optimized path: bf16 matmul operands (f32 accumulation) -> looser tol.
    fn = jax.jit(partial(overlap_patch_embed, stride=stride))
    out = jax.block_until_ready(fn(x, w, b, gamma, beta))
    assert out.shape == (B, H // stride, W // stride, embed_dim), out.shape
    assert jnp.allclose(out, ref, atol=3e-2, rtol=3e-2), \
        float(jnp.max(jnp.abs(out - ref)))

    print("KERNEL_OK")
</pallas_src>

<mosaic_0001>
module attributes {stable_mosaic.version = 11 : i64} {
  func.func @_patch_embed_kernel(%arg0: i32, %arg1: memref<32x196xf32, #tpu.memory_space<vmem>>, %arg2: memref<196x32xf32, #tpu.memory_space<vmem>>, %arg3: memref<1x32xf32, #tpu.memory_space<vmem>>, %arg4: memref<1x32xf32, #tpu.memory_space<vmem>>, %arg5: memref<1x32xf32, #tpu.memory_space<vmem>>, %arg6: memref<32x32xf32, #tpu.memory_space<vmem>>) attributes {dimension_semantics = [#tpu.dimension_semantics<parallel>], iteration_bounds = array<i64: 1>, scalar_prefetch = 0 : i64, scratch_operands = 0 : i64, tpu.core_type = #tpu.core_type<tc>, window_params = [{transform_indices = @transform_0, window_bounds = array<i64: 32, 196>}, {pipeline_mode = #tpu.pipeline_mode<synchronous>, transform_indices = @transform_1, window_bounds = array<i64: 196, 32>}, {pipeline_mode = #tpu.pipeline_mode<synchronous>, transform_indices = @transform_2, window_bounds = array<i64: 1, 32>}, {pipeline_mode = #tpu.pipeline_mode<synchronous>, transform_indices = @transform_3, window_bounds = array<i64: 1, 32>}, {pipeline_mode = #tpu.pipeline_mode<synchronous>, transform_indices = @transform_4, window_bounds = array<i64: 1, 32>}, {transform_indices = @transform_5, window_bounds = array<i64: 32, 32>}]} {
    %c0 = arith.constant 0 : index
    %c0_0 = arith.constant 0 : index
    %0 = vector.load %arg1[%c0, %c0_0] : memref<32x196xf32, #tpu.memory_space<vmem>>, vector<32x196xf32>
    %c0_1 = arith.constant 0 : index
    %c0_2 = arith.constant 0 : index
    %1 = vector.load %arg2[%c0_1, %c0_2] : memref<196x32xf32, #tpu.memory_space<vmem>>, vector<196x32xf32>
    %cst = arith.constant dense<0.000000e+00> : vector<32x32xf32>
    %2 = tpu.matmul %0, %1, %cst {dimension_numbers = #tpu.dot_dimension_numbers<[1], [0], [0], [1], [0, 0, 1, 1], [], []>} : vector<32x196xf32>, vector<196x32xf32>, vector<32x32xf32> -> vector<32x32xf32>
    %c0_3 = arith.constant 0 : index
    %c0_4 = arith.constant 0 : index
    %3 = vector.load %arg3[%c0_3, %c0_4] : memref<1x32xf32, #tpu.memory_space<vmem>>, vector<1x32xf32>
    %4 = vector.broadcast %3 : vector<1x32xf32> to vector<32x32xf32>
    %5 = arith.addf %2, %4 : vector<32x32xf32>
    %cst_5 = arith.constant dense<0.000000e+00> : vector<32xf32>
    %6 = vector.multi_reduction <add>, %5, %cst_5 [1] : vector<32x32xf32> to vector<32xf32>
    %7 = vector.shape_cast %6 : vector<32xf32> to vector<32x1xf32>
    %cst_6 = arith.constant 3.200000e+01 : f32
    %8 = vector.broadcast %cst_6 : f32 to vector<32x1xf32>
    %9 = arith.divf %7, %8 : vector<32x1xf32>
    %10 = vector.broadcast %9 : vector<32x1xf32> to vector<32x32xf32>
    %11 = arith.subf %5, %10 : vector<32x32xf32>
    %12 = arith.mulf %11, %11 : vector<32x32xf32>
    %cst_7 = arith.constant dense<0.000000e+00> : vector<32xf32>
    %13 = vector.multi_reduction <add>, %12, %cst_7 [1] : vector<32x32xf32> to vector<32xf32>
    %14 = vector.shape_cast %13 : vector<32xf32> to vector<32x1xf32>
    %cst_8 = arith.constant 3.200000e+01 : f32
    %15 = vector.broadcast %cst_8 : f32 to vector<32x1xf32>
    %16 = arith.divf %14, %15 : vector<32x1xf32>
    %cst_9 = arith.constant 9.99999974E-6 : f32
    %17 = vector.broadcast %cst_9 : f32 to vector<32x1xf32>
    %18 = arith.addf %16, %17 : vector<32x1xf32>
    %19 = math.rsqrt %18 : vector<32x1xf32>
    %20 = vector.broadcast %19 : vector<32x1xf32> to vector<32x32xf32>
    %21 = arith.mulf %11, %20 : vector<32x32xf32>
    %c0_10 = arith.constant 0 : index
    %c0_11 = arith.constant 0 : index
    %22 = vector.load %arg4[%c0_10, %c0_11] : memref<1x32xf32, #tpu.memory_space<vmem>>, vector<1x32xf32>
    %23 = vector.broadcast %22 : vector<1x32xf32> to vector<32x32xf32>
    %24 = arith.mulf %21, %23 : vector<32x32xf32>
    %c0_12 = arith.constant 0 : index
    %c0_13 = arith.constant 0 : index
    %25 = vector.load %arg5[%c0_12, %c0_13] : memref<1x32xf32, #tpu.memory_space<vmem>>, vector<1x32xf32>
    %26 = vector.broadcast %25 : vector<1x32xf32> to vector<32x32xf32>
    %27 = arith.addf %24, %26 : vector<32x32xf32>
    %c0_14 = arith.constant 0 : index
    %c0_15 = arith.constant 0 : index
    %28 = vector.load %arg6[%c0_14, %c0_15] : memref<32x32xf32, #tpu.memory_space<vmem>>, vector<32x32xf32>
    tpu.vector_store %arg6[%c0_14, %c0_15], %27 {strides = array<i32>} : memref<32x32xf32, #tpu.memory_space<vmem>>, vector<32x32xf32>,
    return
  }
  func.func @transform_0(%arg0: i32) -> (i32, i32) {
    %c0_i32 = arith.constant 0 : i32
    %c0_i32_0 = arith.constant 0 : i32
    return %arg0, %c0_i32 : i32, i32
  }
  func.func @transform_1(%arg0: i32) -> (i32, i32) {
    %c0_i32 = arith.constant 0 : i32
    %c0_i32_0 = arith.constant 0 : i32
    %c0_i32_1 = arith.constant 0 : i32
    return %c0_i32, %c0_i32_0 : i32, i32
  }
  func.func @transform_2(%arg0: i32) -> (i32, i32) {
    %c0_i32 = arith.constant 0 : i32
    %c0_i32_0 = arith.constant 0 : i32
    %c0_i32_1 = arith.constant 0 : i32
    return %c0_i32, %c0_i32_0 : i32, i32
  }
  func.func @transform_3(%arg0: i32) -> (i32, i32) {
    %c0_i32 = arith.constant 0 : i32
    %c0_i32_0 = arith.constant 0 : i32
    %c0_i32_1 = arith.constant 0 : i32
    return %c0_i32, %c0_i32_0 : i32, i32
  }
  func.func @transform_4(%arg0: i32) -> (i32, i32) {
    %c0_i32 = arith.constant 0 : i32
    %c0_i32_0 = arith.constant 0 : i32
    %c0_i32_1 = arith.constant 0 : i32
    return %c0_i32, %c0_i32_0 : i32, i32
  }
  func.func @transform_5(%arg0: i32) -> (i32, i32) {
    %c0_i32 = arith.constant 0 : i32
    %c0_i32_0 = arith.constant 0 : i32
    return %arg0, %c0_i32 : i32, i32
  }
}

</mosaic_0001>

<bundles_post_ra>
// kernel: overlap_patch_embed.1
= control target key start
LH: loop header
LB: loop body
LE: loop exit
PB: predicated region body
PF: predicated region fallthrough
CT: control target
= control target key end

     0   :  { %v351_v1 = vmov 0.0   ;;  %s558_s0 = inlined_call_operand.vmem [shape: f32[32,196], index: 0, kind: input, shape index: {}]   ;;  %s559_s1 = inlined_call_operand.vmem [shape: f32[196,32], index: 1, kind: input, shape index: {}]   ;;  %s560_s2 = inlined_call_operand.vmem [shape: f32[1,32], index: 2, kind: input, shape index: {}]   ;;  %s561_s3 = inlined_call_operand.vmem [shape: f32[1,32], index: 3, kind: input, shape index: {}]   ;;  %s562_s4 = inlined_call_operand.vmem [shape: f32[1,32], index: 4, kind: input, shape index: {}]   ;;  %s563_s5 = inlined_call_operand.hbm [shape: f32[32,32], index: 5, kind: output, shape index: {}]  }
   0x1   :  { %v44_v0 = vld [vmem:[%s559_s1 + $0x78] sm:$0xff]  ;;  %78 = vmatprep.subr.mxu0 %v351_v1  ;;  %267 = vmatprep.subr.mxu1 %v351_v1  ;;  %v43_v2 = vld [vmem:[%s559_s1 + $0x70] sm:$0xff]  ;;  %v42_v3 = vld [vmem:[%s559_s1 + $0x68] sm:$0xff] }
   0x2   :  { %79 = vmatpush1.msra.mxu0 %v44_v0  ;;  %292 = vmatpush1.msra.mxu1 %v44_v0  ;;  %v41_v4 = vld [vmem:[%s559_s1 + $0x60] sm:$0xff]  ;;  %v40_v5 = vld [vmem:[%s559_s1 + $0x58] sm:$0xff]  ;;  %v39_v6 = vld [vmem:[%s559_s1 + $0x50] sm:$0xff] }
   0x3   :  { %80 = vmatprep.subr.mxu0 %v351_v1  ;;  %268 = vmatprep.subr.mxu1 %v351_v1  ;;  %v38_v7 = vld [vmem:[%s559_s1 + $0x48] sm:$0xff] }
   0x4   :  { %81 = vmatpush1.msra.mxu0 %v43_v2  ;;  %293 = vmatpush1.msra.mxu1 %v43_v2 }
   0x5   :  { %82 = vmatprep.subr.mxu0 %v351_v1  ;;  %269 = vmatprep.subr.mxu1 %v351_v1 }
   0x6   :  { %83 = vmatpush1.msra.mxu0 %v42_v3  ;;  %294 = vmatpush1.msra.mxu1 %v42_v3 }
   0x7   :  { %84 = vmatprep.subr.mxu0 %v351_v1  ;;  %270 = vmatprep.subr.mxu1 %v351_v1 }
   0x8   :  { %85 = vmatpush1.msra.mxu0 %v41_v4  ;;  %295 = vmatpush1.msra.mxu1 %v41_v4 }
   0x9   :  { %86 = vmatprep.subr.mxu0 %v351_v1  ;;  %271 = vmatprep.subr.mxu1 %v351_v1 }
   0xa   :  { %87 = vmatpush1.msra.mxu0 %v40_v5  ;;  %296 = vmatpush1.msra.mxu1 %v40_v5 }
   0xb   :  { %88 = vmatprep.subr.mxu0 %v351_v1  ;;  %272 = vmatprep.subr.mxu1 %v351_v1 }
   0xc   :  { %10 = vsyncpa [#allocation3], 0  ;;  %89 = vmatpush1.msra.mxu0 %v39_v6  ;;  %297 = vmatpush1.msra.mxu1 %v39_v6  ;;  %v37_v8 = vld [vmem:[%s559_s1 + $0x40] sm:$0xff]  ;;  %v36_v9 = vld [vmem:[%s559_s1 + $0x38] sm:$0xff]  ;;  %vm74_vm0 = vcmask 1043456   ;;  %vm61_vm1 = vcmask 556032  }
   0xd   :  { %90 = vmatprep.subr.mxu0 %v351_v1  ;;  %273 = vmatprep.subr.mxu1 %v351_v1  ;;  %v35_v10 = vld [vmem:[%s559_s1 + $0x30] sm:$0xff]  ;;  %v34_v11 = vld [vmem:[%s559_s1 + $0x28] sm:$0xff]  ;;  %v33_v12 = vld [vmem:[%s559_s1 + $0x20] sm:$0xff]  ;;  %vm163_vm2 = vcmask 261120  }
   0xe   :  { %91 = vmatpush1.msra.mxu0 %v38_v7  ;;  %298 = vmatpush1.msra.mxu1 %v38_v7  ;;  %v32_v13 = vld [vmem:[%s559_s1 + $0x18] sm:$0xff]  ;;  %v31_v14 = vld [vmem:[%s559_s1 + $0x10] sm:$0xff]  ;;  %v30_v15 = vld [vmem:[%s559_s1 + $0x8] sm:$0xff] }
   0xf   :  { %92 = vmatprep.subr.mxu0 %v351_v1  ;;  %274 = vmatprep.subr.mxu1 %v351_v1  ;;  %v29_v16 = vld [vmem:[%s559_s1] sm:$0xff]  ;;  %v52_v18 = vld [vmem:[%s559_s1 + $0xb8] sm:$0xff]  ;;  %v51_v19 = vld [vmem:[%s559_s1 + $0xb0] sm:$0xff] }
  0x10   :  { %93 = vmatpush1.msra.mxu0 %v37_v8  ;;  %299 = vmatpush1.msra.mxu1 %v37_v8  ;;  %v53_v17 = vld [vmem:[%s559_s1 + $0xc0] sm:$0xf]  ;;  %v50_v20 = vld [vmem:[%s559_s1 + $0xa8] sm:$0xff]  ;;  %v48_v22 = vld [vmem:[%s559_s1 + $0x98] sm:$0xff] }
  0x11   :  { %94 = vmatprep.subr.mxu0 %v351_v1  ;;  %275 = vmatprep.subr.mxu1 %v351_v1  ;;  %v49_v21 = vld [vmem:[%s559_s1 + $0xa0] sm:$0xff]  ;;  %v47_v23 = vld [vmem:[%s559_s1 + $0x90] sm:$0xff]  ;;  %v46_v24 = vld [vmem:[%s559_s1 + $0x88] sm:$0xff] }
  0x12   :  { %95 = vmatpush1.msra.mxu0 %v36_v9  ;;  %300 = vmatpush1.msra.mxu1 %v36_v9  ;;  %v45_v25 = vld [vmem:[%s559_s1 + $0x80] sm:$0xff]  ;;  %v22_v26 = vld [vmem:[%s558_s0 + $0x8] sm:$0xff]  ;;  %v24_v30 = vld [vmem:[%s558_s0 + $0x18] sm:$0xff] }
  0x13   :  { %96 = vmatprep.subr.mxu0 %v351_v1  ;;  %276 = vmatprep.subr.mxu1 %v351_v1  ;;  %v26_v27 = vld [vmem:[%s558_s0 + $0x28] sm:$0xff]  ;;  %v21_v28 = vld [vmem:[%s558_s0] sm:$0xff]  ;;  %v28_v31 = vld [vmem:[%s558_s0 + $0x38] sm:$0xff] }
  0x14   :  { %97 = vmatpush1.msra.mxu0 %v35_v10  ;;  %301 = vmatpush1.msra.mxu1 %v35_v10  ;;  %v25_v29 = vld [vmem:[%s558_s0 + $0x20] sm:$0xff]  ;;  %v23_v32 = vld [vmem:[%s558_s0 + $0x10] sm:$0xff] }
  0x15   :  { %98 = vmatprep.subr.mxu0 %v351_v1  ;;  %277 = vmatprep.subr.mxu1 %v351_v1  ;;  %v27_v33 = vld [vmem:[%s558_s0 + $0x30] sm:$0xff]  ;;  %v259_v34 = vld [vmem:[%s560_s2] ss:$0 sm:$0xff] }
  0x16   :  { %99 = vmatpush1.msra.mxu0 %v34_v11  ;;  %302 = vmatpush1.msra.mxu1 %v34_v11 }
  0x17   :  { %100 = vmatprep.subr.mxu0 %v351_v1  ;;  %278 = vmatprep.subr.mxu1 %v351_v1 }
  0x18   :  { %101 = vmatpush1.msra.mxu0 %v33_v12  ;;  %303 = vmatpush1.msra.mxu1 %v33_v12 }
  0x19   :  { %102 = vmatprep.subr.mxu0 %v351_v1  ;;  %279 = vmatprep.subr.mxu1 %v351_v1 }
  0x1a   :  { %103 = vmatpush1.msra.mxu0 %v32_v13  ;;  %304 = vmatpush1.msra.mxu1 %v32_v13 }
  0x1b   :  { %104 = vmatprep.subr.mxu0 %v351_v1  ;;  %280 = vmatprep.subr.mxu1 %v351_v1 }
  0x1c   :  { %105 = vmatpush1.msra.mxu0 %v31_v14  ;;  %305 = vmatpush1.msra.mxu1 %v31_v14 }
  0x1d   :  { %106 = vmatprep.subr.mxu0 %v351_v1  ;;  %281 = vmatprep.subr.mxu1 %v351_v1 }
  0x1e   :  { %107 = vmatpush1.msra.mxu0 %v30_v15  ;;  %306 = vmatpush1.msra.mxu1 %v30_v15 }
  0x1f   :  { %108 = vmatprep.subr.mxu0 %v351_v1  ;;  %282 = vmatprep.subr.mxu1 %v351_v1 }
  0x20   :  { %109 = vmatpush1.msra.mxu0 %v29_v16  ;;  %307 = vmatpush1.msra.mxu1 %v29_v16 }
  0x21   :  { %124 = vmatprep.subr.mxu0 %v351_v1  ;;  %283 = vmatprep.subr.mxu1 %v351_v1 }
  0x22   :  { %260 = vmatpush2.msk.msra.mxu0 %vm74_vm0, %v53_v17  ;;  %308 = vmatpush2.msk.msra.mxu1 %vm74_vm0, %v53_v17 }
  0x23   :  { %126 = vmatprep.subr.mxu0 %v351_v1  ;;  %284 = vmatprep.subr.mxu1 %v351_v1 }
  0x24   :  { %127 = vmatpush2.msra.mxu0 %v52_v18  ;;  %309 = vmatpush2.msra.mxu1 %v52_v18 }
  0x25   :  { %128 = vmatprep.subr.mxu0 %v351_v1  ;;  %285 = vmatprep.subr.mxu1 %v351_v1 }
  0x26   :  { %129 = vmatpush2.msra.mxu0 %v51_v19  ;;  %310 = vmatpush2.msra.mxu1 %v51_v19 }
  0x27   :  { %130 = vmatprep.subr.mxu0 %v351_v1  ;;  %286 = vmatprep.subr.mxu1 %v351_v1 }
  0x28   :  { %131 = vmatpush2.msra.mxu0 %v50_v20  ;;  %311 = vmatpush2.msra.mxu1 %v50_v20  ;;  %v265_v20 = vld [vmem:[%s561_s3] ss:$0 sm:$0xff]  ;;  %s352_s3 = smov [#allocation2]  }
  0x29   :  { %132 = vmatprep.subr.mxu0 %v351_v1  ;;  %287 = vmatprep.subr.mxu1 %v351_v1  ;;  %s248_s12 = sshll.u32 %s352_s3, 4  ;;  %s249_s12 = int_to_ptr.vmem [resolvable:$true] %s248_s12 }
  0x2a   :  { %133 = vmatpush2.msra.mxu0 %v49_v21  ;;  %312 = vmatpush2.msra.mxu1 %v49_v21  ;;  %p334_p1 = scmp.lt.s32.totalorder %s249_s12, %s249_s12 }
  0x2b   :  { %134 = vmatprep.subr.mxu0 %v351_v1  ;;  %288 = vmatprep.subr.mxu1 %v351_v1 }
  0x2c   :  { %135 = vmatpush2.msra.mxu0 %v48_v22  ;;  %313 = vmatpush2.msra.mxu1 %v48_v22  ;;  %v266_v22 = vld [vmem:[%s562_s4] ss:$0 sm:$0xff]  ;;  %s329_s4 = scalar_lea.vmem %s249_s12, 512 }
  0x2d   :  { %136 = vmatprep.subr.mxu0 %v351_v1  ;;  %289 = vmatprep.subr.mxu1 %v351_v1  ;;  %p330_p0 = scmp.ne.s32.totalorder %s249_s12, %s329_s4  ;;  %p335_p2 = scmp.lt.s32.totalorder %s329_s4, %s329_s4 }
  0x2e   :  { %137 = vmatpush2.msra.mxu0 %v47_v23  ;;  %314 = vmatpush2.msra.mxu1 %v47_v23 }
  0x2f   :  { %138 = vmatprep.subr.mxu0 %v351_v1  ;;  %290 = vmatprep.subr.mxu1 %v351_v1  ;;  %p336_p3 = por %p335_p2, %p334_p1 }
  0x30   :  { %139 = vmatpush2.msra.mxu0 %v46_v24  ;;  %315 = vmatpush2.msra.mxu1 %v46_v24 }
  0x31   :  { %140 = vmatprep.subr.mxu0 %v351_v1  ;;  %291 = vmatprep.subr.mxu1 %v351_v1  ;;  %p337_p4 = pnand %p336_p3, %p330_p0 }
  0x32   :  { %141 = vmatpush2.msra.mxu0 %v45_v25  ;;  %316 = vmatpush2.msra.mxu1 %v45_v25 }
  0x33   :  { %261 = vmatprep.mubr.msk.f32.mxu0 %vm61_vm1, %v22_v26  ;;  %263 = vmatprep.mubr.msk.f32.mxu1 %vm61_vm1, %v26_v27 }
  0x34   :  { %143 = vmatmul.mubr.f32.vlgmr.msra.gmra.mxu0 %v21_v28  ;;  %153 = vmatmul.mubr.f32.vlgmr.msra.gmra.mxu1 %v25_v29 }
  0x35   :  { %262 = vmatprep.mubr.msk.f32.mxu0 %vm61_vm1, %v24_v30  ;;  %264 = vmatprep.mubr.msk.f32.mxu1 %vm61_vm1, %v28_v31 }
  0x38   :  { %148 = vmatmul.mubr.f32.gmra.mxu0 %v23_v32  ;;  %158 = vmatmul.mubr.f32.gmra.mxu1 %v27_v33 }
  0xf4   :  { %v144_v35 = vpop.f32.mrf.mxu0  ;;  %v154_v36 = vpop.f32.mrf.mxu1 }
  0xf5   :  { %v145_v37 = vadd.f32 %v259_v34, %v144_v35  ;;  %v155_v38 = vadd.f32 %v259_v34, %v154_v36 }
  0xf6   :  { %v146_v39 = vpop.f32.mrf.mxu0  ;;  %v156_v40 = vpop.f32.mrf.mxu1 }
  0xf7   :  { %v170_v41 = vsel %vm163_vm2, %v155_v38, 0.0  ;;  %v164_v42 = vsel %vm163_vm2, %v145_v37, 0.0 }
  0xf8   :  { %v159_v43 = vpop.f32.mrf.mxu1  ;;  %171 = vadd.xlane.f32.xlu1 %v170_v41  ;;  %v149_v44 = vpop.f32.mrf.mxu0  ;;  %165 = vadd.xlane.f32.xlu0 %v164_v42 }
  0xf9   :  { %v160_v45 = vadd.f32 %v259_v34, %v159_v43  ;;  %v150_v46 = vadd.f32 %v259_v34, %v149_v44 }
  0xfa   :  { %v151_v47 = vpop.f32.mrf.mxu0  ;;  %v161_v48 = vpop.f32.mrf.mxu1 }
  0xfb   :  { %v173_v49 = vsel %vm163_vm2, %v160_v45, 0.0  ;;  %v167_v50 = vsel %vm163_vm2, %v150_v46, 0.0 }
  0xfc   :  { %174 = vadd.xlane.f32.xlu1 %v173_v49  ;;  %168 = vadd.xlane.f32.xlu0 %v167_v50 }
 0x181   :  { %v172_v51 = vpop.xlane.xlu1 %171  ;;  %v166_v52 = vpop.xlane.xlu0 %165 }
 0x182   :  { %v179_v53 = vmul.f32 0.03125, %v172_v51  ;;  %v177_v54 = vmul.f32 0.03125, %v166_v52 }
 0x184   :  { %v183_v55 = vsub.f32 %v155_v38, %v179_v53  ;;  %v181_v56 = vsub.f32 %v145_v37, %v177_v54 }
 0x185   :  { %v175_v57 = vpop.xlane.xlu1 %174  ;;  %v169_v58 = vpop.xlane.xlu0 %168 }
 0x186   :  { %v180_v59 = vmul.f32 0.03125, %v175_v57  ;;  %v178_v60 = vmul.f32 0.03125, %v169_v58  ;;  %v185_v61 = vmul.f32 %v181_v56, %v181_v56  ;;  %v187_v1 = vmul.f32 %v183_v55, %v183_v55 }
 0x188   :  { %v184_v62 = vsub.f32 %v160_v45, %v180_v59  ;;  %v182_v63 = vsub.f32 %v150_v46, %v178_v60  ;;  %v189_v0 = vsel %vm163_vm2, %v185_v61, 0.0  ;;  %v195_v3 = vsel %vm163_vm2, %v187_v1, 0.0 }
 0x189   :  { %190 = vadd.xlane.f32.xlu0 %v189_v0 }
 0x18a   :  { %v186_v2 = vmul.f32 %v182_v63, %v182_v63  ;;  %v188_v5 = vmul.f32 %v184_v62, %v184_v62 }
 0x18c   :  { %v192_v4 = vsel %vm163_vm2, %v186_v2, 0.0  ;;  %v198_v6 = vsel %vm163_vm2, %v188_v5, 0.0 }
 0x18d   :  { %196 = vadd.xlane.f32.xlu0 %v195_v3  ;;  %193 = vadd.xlane.f32.xlu1 %v192_v4 }
 0x191   :  { %199 = vadd.xlane.f32.xlu1 %v198_v6 }
 0x212   :  { %v191_v7 = vpop.xlane.xlu0 %190 }
 0x213   :  { %v201_v8 = vmul.f32 0.03125, %v191_v7 }
 0x215   :  { %v205_v9 = vadd.f32 1e-05, %v201_v8 }
 0x216   :  { %v194_v10 = vpop.xlane.xlu1 %193  ;;  %v197_v11 = vpop.xlane.xlu0 %196 }
 0x217   :  { %321 = vrsqrt.f32 %v205_v9  ;;  %v202_v12 = vmul.f32 0.03125, %v194_v10  ;;  %v203_v13 = vmul.f32 0.03125, %v197_v11 }
 0x219   :  { %v206_v14 = vadd.f32 1e-05, %v202_v12  ;;  %v207_v15 = vadd.f32 1e-05, %v203_v13 }
 0x21a   :  { %v200_v16 = vpop.xlane.xlu1 %199 }
 0x21b   :  { %323 = vrsqrt.f32 %v206_v14  ;;  %v204_v17 = vmul.f32 0.03125, %v200_v16 }
 0x21c   :  { %325 = vrsqrt.f32 %v207_v15 }
 0x21d   :  { %v208_v18 = vadd.f32 1e-05, %v204_v17 }
 0x21f   :  { %327 = vrsqrt.f32 %v208_v18 }
 0x224   :  { %v322_v19 = vpop.eup %321 }
 0x225   :  { %v213_v21 = vmul.f32 %v322_v19, %v181_v56 }
 0x227   :  { %v224_v23 = vmul.f32 %v265_v20, %v213_v21 }
 0x228   :  { %v324_v24 = vpop.eup %323 }
 0x229   :  { %v326_v25 = vpop.eup %325  ;;  %v214_v26 = vmul.f32 %v324_v24, %v182_v63  ;;  %v235_v27 = vadd.f32 %v266_v22, %v224_v23 }
 0x22a   :  { %v215_v28 = vmul.f32 %v326_v25, %v183_v55 }
 0x22b   :  { %v225_v29 = vmul.f32 %v265_v20, %v214_v26  ;;  %239 = vst.msk [vmem:[#allocation2] sm:$0xff] %vm163_vm2, %v235_v27 }
 0x22c   :  { %v328_v30 = vpop.eup %327  ;;  %v226_v31 = vmul.f32 %v265_v20, %v215_v28 }
 0x22d   :  { %v216_v32 = vmul.f32 %v328_v30, %v184_v62  ;;  %v236_v33 = vadd.f32 %v266_v22, %v225_v29 }
 0x22e   :  { %v237_v34 = vadd.f32 %v266_v22, %v226_v31 }
 0x22f   :  { %v227_v35 = vmul.f32 %v265_v20, %v216_v32  ;;  %240 = vst.msk [vmem:[#allocation2 + $0x8] sm:$0xff] %vm163_vm2, %v236_v33 }
 0x230   :  { %241 = vst.msk [vmem:[#allocation2 + $0x10] sm:$0xff] %vm163_vm2, %v237_v34 }
 0x231   :  { %v238_v36 = vadd.f32 %v266_v22, %v227_v35 }
 0x233   :  { %242 = vst.msk [vmem:[#allocation2 + $0x18] sm:$0xff] %vm163_vm2, %v238_v36 }
 0x234   :  { %340 = shalt.err (!%p337_p4)
}
 0x235   :  { %s353_s13 = smov 128   ;;  %s354_s14 = smov 8  }
 0x236   :  { %254 = dma.vmem_to_hbm [thread:$0]  %s249_s12, 512, %s563_s5, [#allocation3], %s353_s13, %s353_s13, %s354_s14  }
 0x237   :  { %349 = dma.done.wait [#allocation3], 512  }
 0x238   :  { %350 = vsyncadd [#allocation3], 4294966784 }
 0x239   :  { %258 = vsyncpa [#allocation3], 1 }

</bundles_post_ra>
